<compile_context>
chip_gen: v7x
topology: tpu7x:2x2x1
jax: 0.10.0
libtpu: 0.0.40
codegen_flags: <defaults>
</compile_context>

<pallas_src>
import functools

import jax
import jax.numpy as jnp
from jax.experimental import pallas as pl
from jax.experimental.pallas import tpu as pltpu


# ---------------------------------------------------------------------------
# Kernels
# ---------------------------------------------------------------------------

def _latent_head_tiled_kernel(x_ref, t_ref, w1_hbm, w2_hbm, g_ref, be_ref, b2_ref,
                              loss_ref, *scratch,
                              n_total, size_average, denom, offset, use_stash):
    """grid = (phase, n_tile); phase 0: Linear1 + batch stats (+ h stash);
    phase 1: folded BN + ReLU + Linear2 + cosine loss accumulation."""
    if use_stash:
        (w1_ref, w2_ref, wsem, h_stash,
         sum_h, sum_h2, scale, shift, acc) = scratch
    else:
        (w1_ref, w2_ref, wsem,
         sum_h, sum_h2, scale, shift, acc) = scratch
        h_stash = None

    phase = pl.program_id(0)
    tile = pl.program_id(1)
    n_tiles = pl.num_programs(1)

    @pl.when((phase == 0) & (tile == 0))
    def _init():
        # One-shot weight load into single-buffered VMEM scratch (the two DMAs
        # overlap each other and the scalar inits).  Avoids the default
        # double-buffered BlockSpec weight footprint (2x per weight), which can
        # overflow v7x's 64 MiB VMEM for realistic C/H.
        c1 = pltpu.make_async_copy(w1_hbm, w1_ref, wsem.at[0])
        c2 = pltpu.make_async_copy(w2_hbm, w2_ref, wsem.at[1])
        c1.start()
        c2.start()
        sum_h[...] = jnp.zeros_like(sum_h)
        sum_h2[...] = jnp.zeros_like(sum_h2)
        acc[...] = jnp.zeros_like(acc)
        c1.wait()
        c2.wait()

    @pl.when(phase == 0)
    def _linear1_and_stats():
        # bf16/f32 MXU inputs, f32 accumulation.  b1 is intentionally omitted:
        # a bias before BatchNorm shifts mu and is absorbed by the folded shift.
        h = jnp.dot(x_ref[...], w1_ref[...], preferred_element_type=jnp.float32)
        # Sublane (XLU) reduces keep the statistics off the MXU (busy with
        # Linear1); on v5e this also avoids multi-pass f32 MXU emulation.
        sum_h[...] += jnp.sum(h, axis=0, keepdims=True)
        sum_h2[...] += jnp.sum(h * h, axis=0, keepdims=True)
        if use_stash:
            h_stash[tile] = h.astype(h_stash.dtype)

    # NOTE: _finalize_stats writes scale/shift and _loss_tile reads them in the
    # same grid step (phase 1, tile 0); ordering is guaranteed by program order
    # of the ref effects.
    @pl.when((phase == 1) & (tile == 0))
    def _finalize_stats():
        inv_n = 1.0 / n_total
        mu = sum_h[...] * inv_n
        # Single-pass biased variance (PyTorch BN forward uses biased variance).
        var = jnp.maximum(sum_h2[...] * inv_n - mu * mu, 0.0)
        g_inv = g_ref[...].astype(jnp.float32) * jax.lax.rsqrt(var + 1e-5)
        scale[...] = g_inv
        shift[...] = be_ref[...].astype(jnp.float32) - mu * g_inv

    @pl.when(phase == 1)
    def _loss_tile():
        if use_stash:
            h = h_stash[tile].astype(jnp.float32)     # no x re-read, no Linear1 redo
        else:
            h = jnp.dot(x_ref[...], w1_ref[...], preferred_element_type=jnp.float32)
        # folded BN (one scale/shift) + ReLU
        h_act = jnp.maximum(h * scale[...] + shift[...], 0.0)
        pred = (jnp.dot(h_act.astype(w2_ref.dtype), w2_ref[...],
                        preferred_element_type=jnp.float32)
                + b2_ref[...].astype(jnp.float32))
        tgt = t_ref[...].astype(jnp.float32)
        # cosine(pred_i, paired_target_i) without materializing normalized tensors
        pt = jnp.sum(pred * tgt, axis=1, keepdims=True)
        pp = jnp.sum(pred * pred, axis=1, keepdims=True)
        tt = jnp.sum(tgt * tgt, axis=1, keepdims=True)
        # F.normalize clamp: max(||x||, 1e-12) == sqrt(max(sumsq, 1e-24))
        cos = (pt * jax.lax.rsqrt(jnp.maximum(pp, 1e-24))
                  * jax.lax.rsqrt(jnp.maximum(tt, 1e-24)))
        acc[...] += jnp.sum(cos, axis=0, keepdims=True)

    @pl.when((phase == 1) & (tile == n_tiles - 1))
    def _write():
        loss = -2.0 * acc[...]
        if size_average:
            loss = loss / denom + offset
        loss_ref[...] = loss


def _latent_head_single_kernel(x_ref, t_ref, w1_hbm, w2_hbm, g_ref, be_ref, b2_ref,
                               loss_ref, w1_ref, w2_ref, wsem,
                               *, n_total, size_average, denom, offset):
    """Single-pass fast path: the whole (padded) batch fits one tile, so h is
    computed exactly once and x is streamed exactly once."""
    c1 = pltpu.make_async_copy(w1_hbm, w1_ref, wsem.at[0])
    c2 = pltpu.make_async_copy(w2_hbm, w2_ref, wsem.at[1])
    c1.start()
    c2.start()
    c1.wait()
    c2.wait()

    h = jnp.dot(x_ref[...], w1_ref[...], preferred_element_type=jnp.float32)
    inv_n = 1.0 / n_total                      # actual batch size (pad rows give h==0)
    mu = jnp.sum(h, axis=0, keepdims=True) * inv_n
    var = jnp.maximum(jnp.sum(h * h, axis=0, keepdims=True) * inv_n - mu * mu, 0.0)
    scale = g_ref[...].astype(jnp.float32) * jax.lax.rsqrt(var + 1e-5)
    shift = be_ref[...].astype(jnp.float32) - mu * scale

    h_act = jnp.maximum(h * scale + shift, 0.0)
    pred = (jnp.dot(h_act.astype(w2_ref.dtype), w2_ref[...],
                    preferred_element_type=jnp.float32)
            + b2_ref[...].astype(jnp.float32))
    tgt = t_ref[...].astype(jnp.float32)
    pt = jnp.sum(pred * tgt, axis=1, keepdims=True)
    pp = jnp.sum(pred * pred, axis=1, keepdims=True)
    tt = jnp.sum(tgt * tgt, axis=1, keepdims=True)
    cos = (pt * jax.lax.rsqrt(jnp.maximum(pp, 1e-24))
              * jax.lax.rsqrt(jnp.maximum(tt, 1e-24)))
    loss = -2.0 * jnp.sum(cos, axis=0, keepdims=True)
    if size_average:
        loss = loss / denom + offset
    loss_ref[...] = loss


# ---------------------------------------------------------------------------
# Wrapper
# ---------------------------------------------------------------------------

def _round_up(v, m):
    return -(-v // m) * m


def _pad2(a, rows, cols):
    r, c = a.shape
    if (r, c) == (rows, cols):
        return a
    return jnp.pad(a, ((0, rows - r), (0, cols - c)))


def _pick_tile_n(n_pad, max_tile, align):
    """Largest aligned divisor of n_pad that is <= max_tile (align | n_pad)."""
    t = (max_tile // align) * align
    while t >= align:
        if n_pad % t == 0:
            return t
        t -= align
    return align


def _vmem_capacity_bytes():
    try:
        return int(pltpu.get_tpu_info().vmem_capacity_bytes)
    except Exception:
        return 64 * 1024 * 1024       # conservative (v7x-sized) fallback


def latent_predict_head(x, target, params, *, size_average=True, cat_batch=False,
                        compute_dtype=jnp.bfloat16, max_tile_n=None, use_stash=None,
                        pad_lanes=True):
    """LatentPredictHead forward pass. Returns {'loss': scalar}."""
    n, c = x.shape
    w1, b1, gamma, beta, w2, b2 = params
    del b1  # bias before BatchNorm is a mathematical no-op (absorbed by -mu*scale)
    h_dim = w1.shape[1]
    if cat_batch:
        assert n % 2 == 0, "cat_batch=True requires an even batch size"

    itemsize = jnp.dtype(compute_dtype).itemsize
    align = {4: 8, 2: 16, 1: 32}.get(itemsize, 8)   # sublane packing per dtype

    # Per-generation VMEM budget: ~48 MiB on v7x (64 MiB phys), ~96 MiB on v5e/v6e.
    vmem_cap = _vmem_capacity_bytes()
    vmem_limit = int(min(vmem_cap * 3 // 4, 100 * 1024 * 1024))

    c_pad = _round_up(c, 128) if pad_lanes else c
    h_pad = _round_up(h_dim, 128) if pad_lanes else h_dim

    if max_tile_n is None:
        max_tile_n = 1024 if vmem_limit >= 80 * 1024 * 1024 else 512
    # Cap streamed x+target double buffers at ~1/4 of the VMEM budget.
    rows_cap = (vmem_limit // 4) // max(1, 4 * c_pad * itemsize)
    max_tile = max(align, min((max_tile_n // align) * align,
                              (rows_cap // align) * align))

    n_pad = _round_up(n, align)
    single = n_pad <= max_tile
    if single:
        tile_n, num_tiles = n_pad, 1
    else:
        tile_n = _pick_tile_n(n_pad, max_tile, align)
        num_tiles = n_pad // tile_n

    denom, offset = (float(n // 2), 4.0) if cat_batch else (float(n), 2.0)

    # cat_batch pairing: pred row i pairs with target row (i + n/2) mod n.
    tgt = target
    shift_tiles = 0
    if cat_batch:
        half = n // 2
        if (not single) and n_pad == n and half % tile_n == 0:
            shift_tiles = half // tile_n            # pairing purely via index_map
        else:
            tgt = jnp.roll(target, shift=half, axis=0)   # host-side fallback

    # Host-side zero padding (exact: padded x rows give h == 0 because b1 is
    # dropped; padded target rows give cos == 0; padded channels carry zeros).
    x_in = _pad2(x, n_pad, c_pad).astype(compute_dtype)
    t_in = _pad2(tgt, n_pad, c_pad).astype(compute_dtype)
    w1_in = _pad2(w1, c_pad, h_pad).astype(compute_dtype)
    w2_in = _pad2(w2, h_pad, c_pad).astype(compute_dtype)
    g_in = _pad2(gamma.astype(jnp.float32).reshape(1, h_dim), 1, h_pad)
    be_in = _pad2(beta.astype(jnp.float32).reshape(1, h_dim), 1, h_pad)
    b2_in = _pad2(b2.astype(jnp.float32).reshape(1, c), 1, c_pad)

    # Resident, single-buffered weights (manual DMA into exact-size scratch).
    w_scratch = [pltpu.VMEM((c_pad, h_pad), compute_dtype),
                 pltpu.VMEM((h_pad, c_pad), compute_dtype),
                 pltpu.SemaphoreType.DMA((2,))]

    if single:
        kernel = functools.partial(
            _latent_head_single_kernel, n_total=float(n),
            size_average=size_average, denom=denom, offset=offset)
        const1 = lambda i: (0, 0)
        grid_spec = pltpu.PrefetchScalarGridSpec(
            num_scalar_prefetch=0, grid=(1,),
            in_specs=[
                pl.BlockSpec((n_pad, c_pad), const1),      # x
                pl.BlockSpec((n_pad, c_pad), const1),      # target
                pl.BlockSpec(memory_space=pl.ANY),         # w1 (HBM, manual DMA)
                pl.BlockSpec(memory_space=pl.ANY),         # w2 (HBM, manual DMA)
                pl.BlockSpec((1, h_pad), const1),          # gamma
                pl.BlockSpec((1, h_pad), const1),          # beta
                pl.BlockSpec((1, c_pad), const1),          # b2
            ],
            out_specs=pl.BlockSpec((1, 1), const1),
            scratch_shapes=list(w_scratch),
        )
        sems = ("arbitrary",)
        l1_passes, x_reads = 1, 1
    else:
        # h-stash gate: weights + streams + stats + stash must fit the budget.
        if use_stash is None:
            w_bytes = 2 * c_pad * h_pad * itemsize
            stream_bytes = 2 * 2 * tile_n * c_pad * itemsize
            small_bytes = 4 * (4 * h_pad + 2 * (2 * h_pad + c_pad) + 1)
            stash_bytes = n_pad * h_pad * itemsize
            use_stash = (w_bytes + stream_bytes + small_bytes + stash_bytes
                         <= int(vmem_limit * 0.85))

        if use_stash:
            # x fetched only in phase 0; pinned to its last block during phase 1
            # so no extra DMA is issued at all.
            x_map = lambda p, i: ((1 - p) * i + p * (num_tiles - 1), 0)
        else:
            x_map = lambda p, i: (i, 0)
        if shift_tiles:
            # p * (...) pins target to block 0 during phase 0 (never read there).
            tgt_map = lambda p, i: (p * ((i + shift_tiles) % num_tiles), 0)
        else:
            tgt_map = lambda p, i: (p * i, 0)
        const2 = lambda p, i: (0, 0)

        scratch = list(w_scratch)
        if use_stash:
            scratch.append(pltpu.VMEM((num_tiles, tile_n, h_pad), compute_dtype))
        scratch += [
            pltpu.VMEM((1, h_pad), jnp.float32),   # sum(h)
            pltpu.VMEM((1, h_pad), jnp.float32),   # sum(h*h)
            pltpu.VMEM((1, h_pad), jnp.float32),   # folded BN scale
            pltpu.VMEM((1, h_pad), jnp.float32),   # folded BN shift
            pltpu.VMEM((1, 1), jnp.float32),       # loss accumulator
        ]

        kernel = functools.partial(
            _latent_head_tiled_kernel, n_total=float(n),
            size_average=size_average, denom=denom, offset=offset,
            use_stash=use_stash)
        grid_spec = pltpu.PrefetchScalarGridSpec(
            num_scalar_prefetch=0,
            grid=(2, num_tiles),                      # (phase, n_tile)
            in_specs=[
                pl.BlockSpec((tile_n, c_pad), x_map),      # x
                pl.BlockSpec((tile_n, c_pad), tgt_map),    # target (paired tile)
                pl.BlockSpec(memory_space=pl.ANY),         # w1 (HBM, manual DMA)
                pl.BlockSpec(memory_space=pl.ANY),         # w2 (HBM, manual DMA)
                pl.BlockSpec((1, h_pad), const2),          # gamma
                pl.BlockSpec((1, h_pad), const2),          # beta
                pl.BlockSpec((1, c_pad), const2),          # b2
            ],
            out_specs=pl.BlockSpec((1, 1), const2),
            scratch_shapes=scratch,
        )
        sems = ("arbitrary", "arbitrary")   # both axes carry scratch state
        l1_passes = 1 if use_stash else 2
        x_reads = 1 if use_stash else 2

    cost = pl.CostEstimate(
        flops=int(2 * n_pad * c_pad * h_pad * (l1_passes + 1)),
        transcendentals=int(2 * n_pad + h_pad),
        bytes_accessed=int((x_reads + 1) * n_pad * c_pad * itemsize
                           + 2 * c_pad * h_pad * itemsize
                           + 4 * (2 * h_pad + c_pad) + 4),
    )

    loss = pl.pallas_call(
        kernel,
        out_shape=jax.ShapeDtypeStruct((1, 1), jnp.float32),
        grid_spec=grid_spec,
        compiler_params=pltpu.CompilerParams(
            dimension_semantics=sems,
            vmem_limit_bytes=vmem_limit,
        ),
        cost_estimate=cost,
    )(x_in, t_in, w1_in, w2_in, g_in, be_in, b2_in)

    return {"loss": loss[0, 0]}


# ---------------------------------------------------------------------------
# Pure-JAX reference + self-test
# ---------------------------------------------------------------------------

def _reference(x, target, params, *, size_average=True, cat_batch=False):
    """Pure-JAX f32 reference for correctness checking."""
    w1, b1, gamma, beta, w2, b2 = params
    h = x.astype(jnp.float32) @ w1 + b1
    mu = jnp.mean(h, axis=0, keepdims=True)
    var = jnp.mean((h - mu) ** 2, axis=0, keepdims=True)
    h = (h - mu) / jnp.sqrt(var + 1e-5) * gamma + beta
    pred = jnp.maximum(h, 0.0) @ w2 + b2
    pn = pred / jnp.maximum(jnp.linalg.norm(pred, axis=1, keepdims=True), 1e-12)
    tn = target / jnp.maximum(jnp.linalg.norm(target, axis=1, keepdims=True), 1e-12)
    n = x.shape[0]
    if cat_batch:
        half = n // 2
        loss = -2.0 * (jnp.sum(pn[:half] * tn[half:]) + jnp.sum(pn[half:] * tn[:half]))
        if size_average:
            loss = loss / half + 4.0
    else:
        loss = -2.0 * jnp.sum(pn * tn)
        if size_average:
            loss = loss / n + 2.0
    return loss


if __name__ == "__main__":
    C, H = 32, 64  # feature dim, predictor hidden dim

    key = jax.random.PRNGKey(0)
    k_w1, k_b1, k_g, k_be, k_w2, k_b2 = jax.random.split(key, 6)

    w1 = 0.01 * jax.random.normal(k_w1, (C, H), dtype=jnp.float32)
    b1 = 0.01 * jax.random.normal(k_b1, (H,), dtype=jnp.float32)
    gamma = 1.0 + 0.1 * jax.random.normal(k_g, (H,), dtype=jnp.float32)
    beta = 0.1 * jax.random.normal(k_be, (H,), dtype=jnp.float32)
    w2 = 0.01 * jax.random.normal(k_w2, (H, C), dtype=jnp.float32)
    b2 = 0.01 * jax.random.normal(k_b2, (C,), dtype=jnp.float32)
    params = (w1, b1, gamma, beta, w2, b2)

    def make_inputs(nrows):
        kx, kt = jax.random.split(jax.random.fold_in(key, nrows))
        return (jax.random.normal(kx, (nrows, C), dtype=jnp.float32),
                jax.random.normal(kt, (nrows, C), dtype=jnp.float32))

    # 1) Small batch -> single-pass fast path, f32 (tight tolerance).
    x, t = make_inputs(8)
    for cat in (False, True):
        got = jax.block_until_ready(
            latent_predict_head(x, t, params, cat_batch=cat,
                                compute_dtype=jnp.float32)["loss"])
        ref = _reference(x, t, params, cat_batch=cat)
        assert jnp.allclose(got, ref, atol=1e-4, rtol=1e-4), ("f32/N=8", cat, got, ref)

    # 2) Multi-tile two-phase path (N=64, 16-row tiles), with and without the
    #    h-stash, exercising the paired-tile index_map for cat_batch.
    x, t = make_inputs(64)
    for cat in (False, True):
        for stash in (True, False):
            got = jax.block_until_ready(
                latent_predict_head(x, t, params, cat_batch=cat,
                                    compute_dtype=jnp.float32, max_tile_n=16,
                                    use_stash=stash)["loss"])
            ref = _reference(x, t, params, cat_batch=cat)
            assert jnp.allclose(got, ref, atol=1e-4, rtol=1e-4), \
                ("f32/N=64", cat, stash, got, ref)

    # 3) Ragged batch (N=20 -> padded to 24, 8-row tiles), incl. the cat_batch
    #    host-roll fallback when the half batch is not tile aligned.
    x, t = make_inputs(20)
    for cat in (False, True):
        got = jax.block_until_ready(
            latent_predict_head(x, t, params, cat_batch=cat,
                                compute_dtype=jnp.float32, max_tile_n=16)["loss"])
        ref = _reference(x, t, params, cat_batch=cat)
        assert jnp.allclose(got, ref, atol=1e-4, rtol=1e-4), ("f32/N=20", cat, got, ref)

    # 4) Default bf16 MXU/DMA path (looser tolerance vs the f32 reference).
    x, t = make_inputs(8)
    got = jax.block_until_ready(latent_predict_head(x, t, params)["loss"])
    ref = _reference(x, t, params)
    assert jnp.allclose(got, ref, atol=5e-2, rtol=5e-2), ("bf16/N=8", got, ref)

    x, t = make_inputs(64)
    got = jax.block_until_ready(
        latent_predict_head(x, t, params, max_tile_n=16, cat_batch=True)["loss"])
    ref = _reference(x, t, params, cat_batch=True)
    assert jnp.allclose(got, ref, atol=5e-2, rtol=5e-2), ("bf16/N=64", got, ref)

    print("KERNEL_OK")
</pallas_src>

<mosaic_0001>
module attributes {stable_mosaic.version = 11 : i64} {
  func.func @_latent_head_single_kernel(%arg0: i32, %arg1: memref<8x128xf32, #tpu.memory_space<vmem>>, %arg2: memref<8x128xf32, #tpu.memory_space<vmem>>, %arg3: memref<128x128xf32, #tpu.memory_space<any>>, %arg4: memref<128x128xf32, #tpu.memory_space<any>>, %arg5: memref<1x128xf32, #tpu.memory_space<vmem>>, %arg6: memref<1x128xf32, #tpu.memory_space<vmem>>, %arg7: memref<1x128xf32, #tpu.memory_space<vmem>>, %arg8: memref<1x1xf32, #tpu.memory_space<vmem>>, %arg9: memref<128x128xf32, #tpu.memory_space<vmem>>, %arg10: memref<128x128xf32, #tpu.memory_space<vmem>>, %arg11: memref<2x!tpu.dma_semaphore, #tpu.memory_space<semaphore_mem>>) attributes {dimension_semantics = [#tpu.dimension_semantics<arbitrary>], iteration_bounds = array<i64: 1>, scalar_prefetch = 0 : i64, scratch_operands = 3 : i64, tpu.core_type = #tpu.core_type<tc>, window_params = [{pipeline_mode = #tpu.pipeline_mode<synchronous>, transform_indices = @transform_0, window_bounds = array<i64: 8, 128>}, {pipeline_mode = #tpu.pipeline_mode<synchronous>, transform_indices = @transform_1, window_bounds = array<i64: 8, 128>}, {}, {}, {pipeline_mode = #tpu.pipeline_mode<synchronous>, transform_indices = @transform_4, window_bounds = array<i64: 1, 128>}, {pipeline_mode = #tpu.pipeline_mode<synchronous>, transform_indices = @transform_5, window_bounds = array<i64: 1, 128>}, {pipeline_mode = #tpu.pipeline_mode<synchronous>, transform_indices = @transform_6, window_bounds = array<i64: 1, 128>}, {pipeline_mode = #tpu.pipeline_mode<synchronous>, transform_indices = @transform_7, window_bounds = array<i64: 1, 1>}]} {
    %c0_i32 = arith.constant 0 : i32
    %0 = tpu.memref_slice %arg11[%c0_i32] : memref<2x!tpu.dma_semaphore, #tpu.memory_space<semaphore_mem>> -> memref<1x!tpu.dma_semaphore, #tpu.memory_space<semaphore_mem>>
    %1 = tpu.memref_squeeze %0 : memref<1x!tpu.dma_semaphore, #tpu.memory_space<semaphore_mem>> -> memref<!tpu.dma_semaphore, #tpu.memory_space<semaphore_mem>>
    tpu.enqueue_dma source(%arg3 : memref<128x128xf32, #tpu.memory_space<any>>) target(%arg9 : memref<128x128xf32, #tpu.memory_space<vmem>>) target_semaphore(%1 : memref<!tpu.dma_semaphore, #tpu.memory_space<semaphore_mem>>)
    %c1_i32 = arith.constant 1 : i32
    %2 = tpu.memref_slice %arg11[%c1_i32] : memref<2x!tpu.dma_semaphore, #tpu.memory_space<semaphore_mem>> -> memref<1x!tpu.dma_semaphore, #tpu.memory_space<semaphore_mem>>
    %3 = tpu.memref_squeeze %2 : memref<1x!tpu.dma_semaphore, #tpu.memory_space<semaphore_mem>> -> memref<!tpu.dma_semaphore, #tpu.memory_space<semaphore_mem>>
    tpu.enqueue_dma source(%arg4 : memref<128x128xf32, #tpu.memory_space<any>>) target(%arg10 : memref<128x128xf32, #tpu.memory_space<vmem>>) target_semaphore(%3 : memref<!tpu.dma_semaphore, #tpu.memory_space<semaphore_mem>>)
    %c0_i32_0 = arith.constant 0 : i32
    %4 = tpu.memref_slice %arg11[%c0_i32_0] : memref<2x!tpu.dma_semaphore, #tpu.memory_space<semaphore_mem>> -> memref<1x!tpu.dma_semaphore, #tpu.memory_space<semaphore_mem>>
    %5 = tpu.memref_squeeze %4 : memref<1x!tpu.dma_semaphore, #tpu.memory_space<semaphore_mem>> -> memref<!tpu.dma_semaphore, #tpu.memory_space<semaphore_mem>>
    tpu.wait_dma2 semaphore(%5 : memref<!tpu.dma_semaphore, #tpu.memory_space<semaphore_mem>>) src(%arg3 : memref<128x128xf32, #tpu.memory_space<any>>) dst(%arg9 : memref<128x128xf32, #tpu.memory_space<vmem>>)
    %c1_i32_1 = arith.constant 1 : i32
    %6 = tpu.memref_slice %arg11[%c1_i32_1] : memref<2x!tpu.dma_semaphore, #tpu.memory_space<semaphore_mem>> -> memref<1x!tpu.dma_semaphore, #tpu.memory_space<semaphore_mem>>
    %7 = tpu.memref_squeeze %6 : memref<1x!tpu.dma_semaphore, #tpu.memory_space<semaphore_mem>> -> memref<!tpu.dma_semaphore, #tpu.memory_space<semaphore_mem>>
    tpu.wait_dma2 semaphore(%7 : memref<!tpu.dma_semaphore, #tpu.memory_space<semaphore_mem>>) src(%arg4 : memref<128x128xf32, #tpu.memory_space<any>>) dst(%arg10 : memref<128x128xf32, #tpu.memory_space<vmem>>)
    %c0 = arith.constant 0 : index
    %c0_2 = arith.constant 0 : index
    %8 = vector.load %arg1[%c0, %c0_2] : memref<8x128xf32, #tpu.memory_space<vmem>>, vector<8x128xf32>
    %c0_3 = arith.constant 0 : index
    %c0_4 = arith.constant 0 : index
    %9 = vector.load %arg9[%c0_3, %c0_4] : memref<128x128xf32, #tpu.memory_space<vmem>>, vector<128x128xf32>
    %cst = arith.constant dense<0.000000e+00> : vector<8x128xf32>
    %10 = tpu.matmul %8, %9, %cst {dimension_numbers = #tpu.dot_dimension_numbers<[1], [0], [0], [1], [0, 0, 1, 1], [], []>} : vector<8x128xf32>, vector<128x128xf32>, vector<8x128xf32> -> vector<8x128xf32>
    %cst_5 = arith.constant dense<0.000000e+00> : vector<128xf32>
    %11 = vector.multi_reduction <add>, %10, %cst_5 [0] : vector<8x128xf32> to vector<128xf32>
    %12 = vector.shape_cast %11 : vector<128xf32> to vector<1x128xf32>
    %cst_6 = arith.constant 1.250000e-01 : f32
    %13 = vector.broadcast %cst_6 : f32 to vector<1x128xf32>
    %14 = arith.mulf %12, %13 : vector<1x128xf32>
    %15 = arith.mulf %10, %10 : vector<8x128xf32>
    %cst_7 = arith.constant dense<0.000000e+00> : vector<128xf32>
    %16 = vector.multi_reduction <add>, %15, %cst_7 [0] : vector<8x128xf32> to vector<128xf32>
    %17 = vector.shape_cast %16 : vector<128xf32> to vector<1x128xf32>
    %cst_8 = arith.constant 1.250000e-01 : f32
    %18 = vector.broadcast %cst_8 : f32 to vector<1x128xf32>
    %19 = arith.mulf %17, %18 : vector<1x128xf32>
    %20 = arith.mulf %14, %14 : vector<1x128xf32>
    %21 = arith.subf %19, %20 : vector<1x128xf32>
    %cst_9 = arith.constant 0.000000e+00 : f32
    %22 = vector.broadcast %cst_9 : f32 to vector<1x128xf32>
    %23 = arith.maximumf %21, %22 : vector<1x128xf32>
    %c0_10 = arith.constant 0 : index
    %c0_11 = arith.constant 0 : index
    %24 = vector.load %arg5[%c0_10, %c0_11] : memref<1x128xf32, #tpu.memory_space<vmem>>, vector<1x128xf32>
    %cst_12 = arith.constant 9.99999974E-6 : f32
    %25 = vector.broadcast %cst_12 : f32 to vector<1x128xf32>
    %26 = arith.addf %23, %25 : vector<1x128xf32>
    %27 = math.rsqrt %26 : vector<1x128xf32>
    %28 = arith.mulf %24, %27 : vector<1x128xf32>
    %c0_13 = arith.constant 0 : index
    %c0_14 = arith.constant 0 : index
    %29 = vector.load %arg6[%c0_13, %c0_14] : memref<1x128xf32, #tpu.memory_space<vmem>>, vector<1x128xf32>
    %30 = arith.mulf %14, %28 : vector<1x128xf32>
    %31 = arith.subf %29, %30 : vector<1x128xf32>
    %32 = vector.broadcast %28 : vector<1x128xf32> to vector<8x128xf32>
    %33 = arith.mulf %10, %32 : vector<8x128xf32>
    %34 = vector.broadcast %31 : vector<1x128xf32> to vector<8x128xf32>
    %35 = arith.addf %33, %34 : vector<8x128xf32>
    %cst_15 = arith.constant 0.000000e+00 : f32
    %36 = vector.broadcast %cst_15 : f32 to vector<8x128xf32>
    %37 = arith.maximumf %35, %36 : vector<8x128xf32>
    %c0_16 = arith.constant 0 : index
    %c0_17 = arith.constant 0 : index
    %38 = vector.load %arg10[%c0_16, %c0_17] : memref<128x128xf32, #tpu.memory_space<vmem>>, vector<128x128xf32>
    %cst_18 = arith.constant dense<0.000000e+00> : vector<8x128xf32>
    %39 = tpu.matmul %37, %38, %cst_18 {dimension_numbers = #tpu.dot_dimension_numbers<[1], [0], [0], [1], [0, 0, 1, 1], [], []>} : vector<8x128xf32>, vector<128x128xf32>, vector<8x128xf32> -> vector<8x128xf32>
    %c0_19 = arith.constant 0 : index
    %c0_20 = arith.constant 0 : index
    %40 = vector.load %arg7[%c0_19, %c0_20] : memref<1x128xf32, #tpu.memory_space<vmem>>, vector<1x128xf32>
    %41 = vector.broadcast %40 : vector<1x128xf32> to vector<8x128xf32>
    %42 = arith.addf %39, %41 : vector<8x128xf32>
    %c0_21 = arith.constant 0 : index
    %c0_22 = arith.constant 0 : index
    %43 = vector.load %arg2[%c0_21, %c0_22] : memref<8x128xf32, #tpu.memory_space<vmem>>, vector<8x128xf32>
    %44 = arith.mulf %42, %43 : vector<8x128xf32>
    %cst_23 = arith.constant dense<0.000000e+00> : vector<8xf32>
    %45 = vector.multi_reduction <add>, %44, %cst_23 [1] : vector<8x128xf32> to vector<8xf32>
    %46 = vector.shape_cast %45 : vector<8xf32> to vector<8x1xf32>
    %47 = arith.mulf %42, %42 : vector<8x128xf32>
    %cst_24 = arith.constant dense<0.000000e+00> : vector<8xf32>
    %48 = vector.multi_reduction <add>, %47, %cst_24 [1] : vector<8x128xf32> to vector<8xf32>
    %49 = vector.shape_cast %48 : vector<8xf32> to vector<8x1xf32>
    %50 = arith.mulf %43, %43 : vector<8x128xf32>
    %cst_25 = arith.constant dense<0.000000e+00> : vector<8xf32>
    %51 = vector.multi_reduction <add>, %50, %cst_25 [1] : vector<8x128xf32> to vector<8xf32>
    %52 = vector.shape_cast %51 : vector<8xf32> to vector<8x1xf32>
    %cst_26 = arith.constant 1.000000e-24 : f32
    %53 = vector.broadcast %cst_26 : f32 to vector<8x1xf32>
    %54 = arith.maximumf %49, %53 : vector<8x1xf32>
    %55 = math.rsqrt %54 : vector<8x1xf32>
    %56 = arith.mulf %46, %55 : vector<8x1xf32>
    %cst_27 = arith.constant 1.000000e-24 : f32
    %57 = vector.broadcast %cst_27 : f32 to vector<8x1xf32>
    %58 = arith.maximumf %52, %57 : vector<8x1xf32>
    %59 = math.rsqrt %58 : vector<8x1xf32>
    %60 = arith.mulf %56, %59 : vector<8x1xf32>
    %cst_28 = arith.constant dense<0.000000e+00> : vector<1xf32>
    %61 = vector.multi_reduction <add>, %60, %cst_28 [0] : vector<8x1xf32> to vector<1xf32>
    %62 = vector.shape_cast %61 : vector<1xf32> to vector<1x1xf32>
    %cst_29 = arith.constant -2.000000e+00 : f32
    %63 = vector.broadcast %cst_29 : f32 to vector<1x1xf32>
    %64 = arith.mulf %63, %62 : vector<1x1xf32>
    %cst_30 = arith.constant 8.000000e+00 : f32
    %65 = vector.broadcast %cst_30 : f32 to vector<1x1xf32>
    %66 = arith.divf %64, %65 : vector<1x1xf32>
    %cst_31 = arith.constant 2.000000e+00 : f32
    %67 = vector.broadcast %cst_31 : f32 to vector<1x1xf32>
    %68 = arith.addf %66, %67 : vector<1x1xf32>
    %c0_32 = arith.constant 0 : index
    %c0_33 = arith.constant 0 : index
    %69 = vector.load %arg8[%c0_32, %c0_33] : memref<1x1xf32, #tpu.memory_space<vmem>>, vector<1x1xf32>
    tpu.vector_store %arg8[%c0_32, %c0_33], %68 {strides = array<i32>} : memref<1x1xf32, #tpu.memory_space<vmem>>, vector<1x1xf32>,
    return
  }
  func.func @transform_0(%arg0: i32) -> (i32, i32) {
    %c0_i32 = arith.constant 0 : i32
    %c0_i32_0 = arith.constant 0 : i32
    %c0_i32_1 = arith.constant 0 : i32
    return %c0_i32, %c0_i32_0 : i32, i32
  }
  func.func @transform_1(%arg0: i32) -> (i32, i32) {
    %c0_i32 = arith.constant 0 : i32
    %c0_i32_0 = arith.constant 0 : i32
    %c0_i32_1 = arith.constant 0 : i32
    return %c0_i32, %c0_i32_0 : i32, i32
  }
  func.func @transform_4(%arg0: i32) -> (i32, i32) {
    %c0_i32 = arith.constant 0 : i32
    %c0_i32_0 = arith.constant 0 : i32
    %c0_i32_1 = arith.constant 0 : i32
    return %c0_i32, %c0_i32_0 : i32, i32
  }
  func.func @transform_5(%arg0: i32) -> (i32, i32) {
    %c0_i32 = arith.constant 0 : i32
    %c0_i32_0 = arith.constant 0 : i32
    %c0_i32_1 = arith.constant 0 : i32
    return %c0_i32, %c0_i32_0 : i32, i32
  }
  func.func @transform_6(%arg0: i32) -> (i32, i32) {
    %c0_i32 = arith.constant 0 : i32
    %c0_i32_0 = arith.constant 0 : i32
    %c0_i32_1 = arith.constant 0 : i32
    return %c0_i32, %c0_i32_0 : i32, i32
  }
  func.func @transform_7(%arg0: i32) -> (i32, i32) {
    %c0_i32 = arith.constant 0 : i32
    %c0_i32_0 = arith.constant 0 : i32
    %c0_i32_1 = arith.constant 0 : i32
    return %c0_i32, %c0_i32_0 : i32, i32
  }
}

</mosaic_0001>

<bundles_post_ra>
// kernel: tpu_custom_call.1
= control target key start
LH: loop header
LB: loop body
LE: loop exit
PB: predicated region body
PF: predicated region fallthrough
CT: control target
= control target key end

     0   :  { %12 = vsyncpa [#allocation6], 0  ;;  %s774_s0 = inlined_call_operand.hbm [shape: f32[8,128], index: 0, kind: input, shape index: {}]   ;;  %s775_s1 = inlined_call_operand.hbm [shape: f32[8,128], index: 1, kind: input, shape index: {}]   ;;  %s776_s2 = inlined_call_operand.hbm [shape: f32[128,128], index: 2, kind: input, shape index: {}]   ;;  %s777_s3 = inlined_call_operand.hbm [shape: f32[128,128], index: 3, kind: input, shape index: {}]   ;;  %s778_s4 = inlined_call_operand.vmem [shape: f32[1,128], index: 4, kind: input, shape index: {}]   ;;  %s779_s5 = inlined_call_operand.vmem [shape: f32[1,128], index: 5, kind: input, shape index: {}]   ;;  %s780_s6 = inlined_call_operand.vmem [shape: f32[1,128], index: 6, kind: input, shape index: {}]   ;;  %s781_s7 = inlined_call_operand.hbm [shape: f32[1,1], index: 7, kind: output, shape index: {}]  }
   0x1   :  { %13 = vsyncpa [#allocation9], 0 }
   0x2   :  { %14 = vsyncpa [#allocation7], 0  ;;  %s641_s24 = smov [#allocation5]   ;;  %s642_s26 = smov [#allocation8]  }
   0x3   :  { %s21_s25 = sshll.u32 %s641_s24, 4  ;;  %s31_s27 = sshll.u32 %s642_s26, 4  ;;  %s22_s25 = int_to_ptr.vmem [resolvable:$true] %s21_s25  ;;  %s32_s27 = int_to_ptr.vmem [resolvable:$true] %s31_s27 }
   0x4   :  { %s521_s30 = scalar_lea.hbm %s774_s0, 128 }
   0x5   :  { %p522_p0 = scmp.ne.s32.totalorder %s774_s0, %s521_s30  ;;  %p525_p1 = scmp.lt.u32.totalorder %s521_s30, %s774_s0 }
   0x7   :  { %p527_p2 = pnand %p525_p1, %p522_p0 }
   0x9   :  { %530 = shalt.err (!%p527_p2)
}
   0xa   :  { %s531_s12 = scalar_lea.vmem %s22_s25, 128  ;;  %p536_p4 = scmp.lt.s32.totalorder %s22_s25, %s22_s25 }
   0xb   :  { %p532_p3 = scmp.ne.s32.totalorder %s22_s25, %s531_s12  ;;  %p537_p5 = scmp.lt.s32.totalorder %s531_s12, %s531_s12 }
   0xd   :  { %p538_p6 = por %p537_p5, %p536_p4 }
   0xf   :  { %p539_p7 = pnand %p538_p6, %p532_p3 }
  0x11   :  { %542 = shalt.err (!%p539_p7)
}
  0x12   :  { %24 = dma.hbm_to_vmem [thread:$0]  %s774_s0, 128, %s22_s25, [#allocation6]  }
  0x13   :  { %s543_s17 = scalar_lea.hbm %s775_s1, 128 }
  0x14   :  { %p544_p8 = scmp.ne.s32.totalorder %s775_s1, %s543_s17  ;;  %p547_p9 = scmp.lt.u32.totalorder %s543_s17, %s775_s1 }
  0x16   :  { %p549_p10 = pnand %p547_p9, %p544_p8 }
  0x18   :  { %552 = shalt.err (!%p549_p10)
}
  0x19   :  { %s553_s22 = scalar_lea.vmem %s32_s27, 128  ;;  %p558_p12 = scmp.lt.s32.totalorder %s32_s27, %s32_s27 }
  0x1a   :  { %p554_p11 = scmp.ne.s32.totalorder %s32_s27, %s553_s22  ;;  %p559_p13 = scmp.lt.s32.totalorder %s553_s22, %s553_s22 }
  0x1c   :  { %p560_p0 = por %p559_p13, %p558_p12 }
  0x1e   :  { %p561_p1 = pnand %p560_p0, %p554_p11 }
  0x20   :  { %564 = shalt.err (!%p561_p1)
}
  0x21   :  { %34 = dma.hbm_to_vmem [thread:$0]  %s775_s1, 128, %s32_s27, [#allocation9]  }
  0x22   :  { %631 = dma.done.wait [#allocation6], 128  }
  0x23   :  { %632 = vsyncadd [#allocation6], 4294967168 }
  0x24   :  { %633 = dma.done.wait [#allocation9], 128  }
  0x25   :  { %634 = vsyncadd [#allocation9], 4294967168  ;;  %s643_s24 = smov [#allocation2]   ;;  %s644_s26 = smov [#allocation3]  }
  0x26   :  { %s54_s25 = sshll.u32 %s643_s24, 4  ;;  %s66_s28 = sshll.u32 %s644_s26, 4  ;;  %s55_s25 = int_to_ptr.vmem [resolvable:$true] %s54_s25  ;;  %s67_s28 = int_to_ptr.vmem [resolvable:$true] %s66_s28 }
  0x27   :  { %s565_s8 = scalar_lea.hbm %s776_s2, 2048 }
  0x28   :  { %p566_p2 = scmp.ne.s32.totalorder %s776_s2, %s565_s8  ;;  %p569_p3 = scmp.lt.u32.totalorder %s565_s8, %s776_s2 }
  0x2a   :  { %p571_p4 = pnand %p569_p3, %p566_p2 }
  0x2c   :  { %574 = shalt.err (!%p571_p4)  }
  0x2d   :  { %s575_s27 = scalar_lea.vmem %s55_s25, 2048  ;;  %p580_p6 = scmp.lt.s32.totalorder %s55_s25, %s55_s25 }
  0x2e   :  { %p576_p5 = scmp.ne.s32.totalorder %s55_s25, %s575_s27  ;;  %p581_p7 = scmp.lt.s32.totalorder %s575_s27, %s575_s27 }
  0x30   :  { %p582_p8 = por %p581_p7, %p580_p6 }
  0x32   :  { %p583_p9 = pnand %p582_p8, %p576_p5 }
  0x34   :  { %586 = shalt.err (!%p583_p9)  }
  0x35   :  { %57 = dma.hbm_to_vmem [thread:$0]  %s776_s2, 2048, %s55_s25, [#allocation4] }
  0x36   :  { %s587_s16 = scalar_lea.hbm %s777_s3, 2048 }
  0x37   :  { %p588_p10 = scmp.ne.s32.totalorder %s777_s3, %s587_s16  ;;  %p591_p11 = scmp.lt.u32.totalorder %s587_s16, %s777_s3 }
  0x39   :  { %p593_p12 = pnand %p591_p11, %p588_p10 }
  0x3b   :  { %596 = shalt.err (!%p593_p12)  }
  0x3c   :  { %s597_s21 = scalar_lea.vmem %s67_s28, 2048  ;;  %p602_p0 = scmp.lt.s32.totalorder %s67_s28, %s67_s28 }
  0x3d   :  { %p598_p13 = scmp.ne.s32.totalorder %s67_s28, %s597_s21  ;;  %p603_p1 = scmp.lt.s32.totalorder %s597_s21, %s597_s21 }
  0x3f   :  { %p604_p2 = por %p603_p1, %p602_p0 }
  0x41   :  { %p605_p3 = pnand %p604_p2, %p598_p13 }
  0x43   :  { %608 = shalt.err (!%p605_p3)  }
  0x44   :  { %69 = dma.hbm_to_vmem [thread:$0]  %s777_s3, 2048, %s67_s28, [#allocation4 + $0x1] }
  0x45   :  { %635 = dma.done.wait [#allocation4], 2048 }
  0x46   :  { %636 = vsyncadd [#allocation4], 4294965248 }
  0x47   :  { %637 = dma.done.wait [#allocation4 + $0x1], 2048 }
  0x48   :  { %638 = vsyncadd [#allocation4 + $0x1], 4294965248  ;;  %v645_v0 = vmov 0.0|0.0   ;;  %vm646_vm0 = vmmov 0   ;;  %v647_v1 = vmov 0.0   ;;  %v76_v2 = vld [vmem:[#allocation2] sm:$0xff] }
  0x49   :  { %459 = vmatprep.subr.bf16.mxu0 %v645_v0  ;;  %421 = vmatprep.mubr.msk.f32.mxu0 %vm646_vm0, %v647_v1  ;;  %v77_v3 = vld [vmem:[#allocation2 + $0x8] sm:$0xff]  ;;  %v78_v4 = vld [vmem:[#allocation2 + $0x10] sm:$0xff]  ;;  %v79_v6 = vld [vmem:[#allocation2 + $0x18] sm:$0xff]  ;;  %vm321_vm1 = vcmask 0  }
  0x4a   :  { %483 = vmatprep.subr.bf16.mxu1 %v645_v0  ;;  %456 = vmatprep.mubr.msk.f32.mxu1 %vm646_vm0, %v647_v1  ;;  %v460_v5 = vpack.c.bf16 %v77_v3, %v76_v2  ;;  %v463_v7 = vpack.c.bf16 %v79_v6, %v78_v4  ;;  %v80_v8 = vld [vmem:[#allocation2 + $0x20] sm:$0xff]  ;;  %v81_v9 = vld [vmem:[#allocation2 + $0x28] sm:$0xff]  ;;  %v82_v11 = vld [vmem:[#allocation2 + $0x30] sm:$0xff] }
  0x4b   :  { %v466_v10 = vpack.c.bf16 %v81_v9, %v80_v8  ;;  %v83_v12 = vld [vmem:[#allocation2 + $0x38] sm:$0xff]  ;;  %v84_v14 = vld [vmem:[#allocation2 + $0x40] sm:$0xff]  ;;  %v85_v15 = vld [vmem:[#allocation2 + $0x48] sm:$0xff]  ;;  %v188_v8 = vlaneseq }
  0x4c   :  { %461 = vmatpush3.bf16.msra.mxu0 %v460_v5  ;;  %v469_v13 = vpack.c.bf16 %v83_v12, %v82_v11  ;;  %v472_v16 = vpack.c.bf16 %v85_v15, %v84_v14  ;;  %v86_v17 = vld [vmem:[#allocation2 + $0x50] sm:$0xff]  ;;  %v87_v18 = vld [vmem:[#allocation2 + $0x58] sm:$0xff]  ;;  %v88_v20 = vld [vmem:[#allocation2 + $0x60] sm:$0xff] }
  0x4d   :  { %462 = vmatprep.subr.bf16.mxu0 %v645_v0  ;;  %v475_v19 = vpack.c.bf16 %v87_v18, %v86_v17  ;;  %v89_v21 = vld [vmem:[#allocation2 + $0x68] sm:$0xff]  ;;  %v90_v23 = vld [vmem:[#allocation2 + $0x70] sm:$0xff]  ;;  %v91_v24 = vld [vmem:[#allocation2 + $0x78] sm:$0xff]  ;;  %v189_v9 = vshrl.u32 %v188_v8, 7 }
  0x4e   :  { %v478_v22 = vpack.c.bf16 %v89_v21, %v88_v20  ;;  %v481_v25 = vpack.c.bf16 %v91_v24, %v90_v23  ;;  %v75_v26 = vld [vmem:[#allocation5] sm:$0xff]  ;;  %v203_v28 = vld [vmem:[#allocation3 + $0x8] sm:$0xff]  ;;  %v204_v30 = vld [vmem:[#allocation3 + $0x10] sm:$0xff] }
  0x4f   :  { %v202_v27 = vld [vmem:[#allocation3] sm:$0xff]  ;;  %v205_v31 = vld [vmem:[#allocation3 + $0x18] sm:$0xff]  ;;  %v207_v34 = vld [vmem:[#allocation3 + $0x28] sm:$0xff]  ;;  %v190_v11 = vsub.s32 0, %v189_v9 }
  0x50   :  { %464 = vmatpush3.bf16.msra.mxu0 %v463_v7  ;;  %v484_v29 = vpack.c.bf16 %v203_v28, %v202_v27  ;;  %v487_v32 = vpack.c.bf16 %v205_v31, %v204_v30  ;;  %v206_v33 = vld [vmem:[#allocation3 + $0x20] sm:$0xff]  ;;  %v208_v36 = vld [vmem:[#allocation3 + $0x30] sm:$0xff]  ;;  %v209_v37 = vld [vmem:[#allocation3 + $0x38] sm:$0xff] }
  0x51   :  { %465 = vmatprep.subr.bf16.mxu0 %v645_v0  ;;  %v490_v35 = vpack.c.bf16 %v207_v34, %v206_v33  ;;  %v493_v38 = vpack.c.bf16 %v209_v37, %v208_v36  ;;  %v210_v39 = vld [vmem:[#allocation3 + $0x40] sm:$0xff]  ;;  %v211_v40 = vld [vmem:[#allocation3 + $0x48] sm:$0xff]  ;;  %v212_v42 = vld [vmem:[#allocation3 + $0x50] sm:$0xff] }
  0x52   :  { %485 = vmatpush3.bf16.msra.mxu1 %v484_v29  ;;  %v496_v41 = vpack.c.bf16 %v211_v40, %v210_v39  ;;  %v213_v43 = vld [vmem:[#allocation3 + $0x58] sm:$0xff]  ;;  %v214_v45 = vld [vmem:[#allocation3 + $0x60] sm:$0xff]  ;;  %v215_v46 = vld [vmem:[#allocation3 + $0x68] sm:$0xff] }
  0x53   :  { %486 = vmatprep.subr.bf16.mxu1 %v645_v0  ;;  %v499_v44 = vpack.c.bf16 %v213_v43, %v212_v42  ;;  %v502_v47 = vpack.c.bf16 %v215_v46, %v214_v45  ;;  %v216_v48 = vld [vmem:[#allocation3 + $0x70] sm:$0xff]  ;;  %v217_v49 = vld [vmem:[#allocation3 + $0x78] sm:$0xff]  ;;  %v184_v14 = vld [vmem:[%s779_s5] sm:$0x1] }
  0x54   :  { %467 = vmatpush3.bf16.msra.mxu0 %v466_v10  ;;  %v505_v50 = vpack.c.bf16 %v217_v49, %v216_v48  ;;  %v180_v10 = vld [vmem:[%s778_s4] sm:$0x1]  ;;  %v295_v24 = vld [vmem:[#allocation8] sm:$0xff]  ;;  %s648_s4 = smov [#allocation10]  }
  0x55   :  { %468 = vmatprep.subr.bf16.mxu0 %v645_v0  ;;  %v302_v29 = vmul.f32 %v295_v24, %v295_v24  ;;  %s329_s5 = sshll.u32 %s648_s4, 4  ;;  %s330_s5 = int_to_ptr.vmem [resolvable:$true] %s329_s5 }
  0x56   :  { %488 = vmatpush3.bf16.msra.mxu1 %v487_v32  ;;  %s613_s28 = scalar_lea.vmem %s330_s5, 32  ;;  %p614_p5 = scmp.lt.s32.totalorder %s330_s5, %s330_s5 }
  0x57   :  { %489 = vmatprep.subr.bf16.mxu1 %v645_v0 }
  0x58   :  { %470 = vmatpush3.bf16.msra.mxu0 %v469_v13 }
  0x59   :  { %471 = vmatprep.subr.bf16.mxu0 %v645_v0 }
  0x5a   :  { %491 = vmatpush3.bf16.msra.mxu1 %v490_v35 }
  0x5b   :  { %492 = vmatprep.subr.bf16.mxu1 %v645_v0 }
  0x5c   :  { %473 = vmatpush3.bf16.msra.mxu0 %v472_v16 }
  0x5d   :  { %474 = vmatprep.subr.bf16.mxu0 %v645_v0 }
  0x5e   :  { %494 = vmatpush3.bf16.msra.mxu1 %v493_v38 }
  0x5f   :  { %495 = vmatprep.subr.bf16.mxu1 %v645_v0 }
  0x60   :  { %476 = vmatpush3.bf16.msra.mxu0 %v475_v19 }
  0x61   :  { %477 = vmatprep.subr.bf16.mxu0 %v645_v0 }
  0x62   :  { %497 = vmatpush3.bf16.msra.mxu1 %v496_v41 }
  0x63   :  { %498 = vmatprep.subr.bf16.mxu1 %v645_v0 }
  0x64   :  { %479 = vmatpush3.bf16.msra.mxu0 %v478_v22  ;;  %v352_v22 = vld [vmem:[%s780_s6] ss:$0 sm:$0xff]  ;;  %s609_s6 = scalar_lea.vmem %s330_s5, 16 }
  0x65   :  { %480 = vmatprep.subr.bf16.mxu0 %v645_v0  ;;  %p610_p4 = scmp.ne.s32.totalorder %s330_s5, %s609_s6  ;;  %p615_p6 = scmp.lt.s32.totalorder %s613_s28, %s609_s6 }
  0x66   :  { %500 = vmatpush3.bf16.msra.mxu1 %v499_v44 }
  0x67   :  { %501 = vmatprep.subr.bf16.mxu1 %v645_v0  ;;  %p616_p7 = por %p615_p6, %p614_p5 }
  0x68   :  { %482 = vmatpush3.bf16.msra.mxu0 %v481_v25 }
  0x69   :  { %p617_p8 = pnand %p616_p7, %p610_p4 }
  0x6a   :  { %503 = vmatpush3.bf16.msra.mxu1 %v502_v47 }
  0x6b   :  { %422 = vmatmul.mubr.f32.vlgmr.msra.gmra.mrb[0].mxu0 %v75_v26  ;;  %504 = vmatprep.subr.bf16.mxu1 %v645_v0 }
  0x6e   :  { %506 = vmatpush3.bf16.msra.mxu1 %v505_v50 }
 0x13e   :  { %v158_v51 = vpop.f32.mrb[0].mxu0 }
 0x13f   :  { %v162_v52 = vrot.slane %v158_v51, 4  ;;  %v169_v53 = vmul.f32 %v158_v51, %v158_v51  ;;  %v423_v54 = vpop.f32.mrb[1].mxu0 }
 0x141   :  { %v163_v55 = vadd.f32 %v162_v52, %v158_v51  ;;  %v170_v56 = vrot.slane %v169_v53, 4 }
 0x143   :  { %v164_v57 = vrot.slane %v163_v55, 2  ;;  %v171_v58 = vadd.f32 %v170_v56, %v169_v53 }
 0x145   :  { %v165_v59 = vadd.f32 %v164_v57, %v163_v55  ;;  %v172_v60 = vrot.slane %v171_v58, 2 }
 0x147   :  { %v166_v61 = vrot.slane %v165_v59, 1  ;;  %v173_v62 = vadd.f32 %v172_v60, %v171_v58 }
 0x149   :  { %v167_v63 = vadd.f32 %v166_v61, %v165_v59  ;;  %v174_v1 = vrot.slane %v173_v62, 1 }
 0x14b   :  { %v168_v2 = vmul.f32 0.125, %v167_v63  ;;  %v175_v3 = vadd.f32 %v174_v1, %v173_v62 }
 0x14d   :  { %v176_v4 = vmul.f32 0.125, %v175_v3  ;;  %v177_v5 = vmul.f32 %v168_v2, %v168_v2 }
 0x14f   :  { %v178_v0 = vsub.f32 %v176_v4, %v177_v5 }
 0x151   :  { %v179_v6 = vmax.f32 %v178_v0, 0.0 }
 0x153   :  { %v181_v7 = vadd.f32 1e-05, %v179_v6 }
 0x155   :  { %515 = vrsqrt.f32 %v181_v7 }
 0x15f   :  { %v516_v12 = vpop.eup %515 }
 0x160   :  { %v183_v13 = vmul.f32 %v516_v12, %v180_v10 }
 0x162   :  { %v191_v15 = vrot.slane %v183_v13, %v190_v11  ;;  %v185_v16 = vmul.f32 %v183_v13, %v168_v2 }
 0x164   :  { %v186_v17 = vsub.f32 %v184_v14, %v185_v16  ;;  %v193_v18 = vmul.f32 %v191_v15, %v158_v51 }
 0x166   :  { %v198_v19 = vrot.slane %v186_v17, %v190_v11 }
 0x168   :  { %v200_v20 = vadd.f32 %v198_v19, %v193_v18 }
 0x16a   :  { %v201_v21 = vmax.f32 %v200_v20, 0.0 }
 0x16c   :  { %457 = vmatmul.mubr.f32.vlgmr.msra.gmra.mrb[0].mxu1 %v201_v21 }
 0x23f   :  { %v291_v23 = vpop.f32.mrb[0].mxu1 }
 0x240   :  { %v292_v25 = vadd.f32 %v352_v22, %v291_v23  ;;  %v458_v26 = vpop.f32.mrb[1].mxu1 }
 0x242   :  { %v299_v27 = vmul.f32 %v292_v25, %v292_v25  ;;  %v296_v28 = vmul.f32 %v295_v24, %v292_v25 }
 0x244   :  { %300 = vadd.xlane.f32.xlu0 %v299_v27  ;;  %297 = vadd.xlane.f32.xlu1 %v296_v28 }
 0x248   :  { %303 = vadd.xlane.f32.xlu0 %v302_v29 }
 0x2d1   :  { %v301_v30 = vpop.xlane.xlu0 %300  ;;  %v298_v35 = vpop.xlane.xlu1 %297 }
 0x2d2   :  { %v305_v31 = vmax.f32 %v301_v30, 1e-24 }
 0x2d4   :  { %517 = vrsqrt.f32 %v305_v31 }
 0x2d5   :  { %v304_v32 = vpop.xlane.xlu0 %303 }
 0x2d6   :  { %v308_v33 = vmax.f32 %v304_v32, 1e-24 }
 0x2d8   :  { %519 = vrsqrt.f32 %v308_v33 }
 0x2de   :  { %v518_v34 = vpop.eup %517 }
 0x2df   :  { %v307_v36 = vmul.f32 %v518_v34, %v298_v35 }
 0x2e2   :  { %v520_v37 = vpop.eup %519 }
 0x2e3   :  { %v310_v38 = vmul.f32 %v520_v37, %v307_v36 }
 0x2e5   :  { %v311_v39 = vrot.slane %v310_v38, 4 }
 0x2e7   :  { %v312_v40 = vadd.f32 %v311_v39, %v310_v38 }
 0x2e9   :  { %v313_v41 = vrot.slane %v312_v40, 2 }
 0x2eb   :  { %v314_v42 = vadd.f32 %v313_v41, %v312_v40 }
 0x2ed   :  { %v315_v43 = vrot.slane %v314_v42, 1 }
 0x2ef   :  { %v316_v44 = vadd.f32 %v315_v43, %v314_v42 }
 0x2f1   :  { %v317_v45 = vmul.f32 -2.0, %v316_v44 }
 0x2f3   :  { %v319_v46 = vmul.f32 0.125, %v317_v45 }
 0x2f5   :  { %v320_v47 = vadd.f32 2.0, %v319_v46 }
 0x2f7   :  { %322 = vst.msk [vmem:[#allocation10] sm:$0x1] %vm321_vm1, %v320_v47 }
 0x2f8   :  { %620 = shalt.err (!%p617_p8)
}
 0x2f9   :  { %s621_s8 = scalar_lea.hbm %s781_s7, 16 }
 0x2fa   :  { %p622_p9 = scmp.ne.s32.totalorder %s781_s7, %s621_s8  ;;  %p625_p10 = scmp.lt.u32.totalorder %s621_s8, %s781_s7 }
 0x2fc   :  { %p627_p11 = pnand %p625_p10, %p622_p9 }
 0x2fe   :  { %630 = shalt.err (!%p627_p11)
}
 0x2ff   :  { %332 = dma.vmem_to_hbm [thread:$0]  %s330_s5, 16, %s781_s7, [#allocation7]  }
 0x300   :  { %639 = dma.done.wait [#allocation7], 16  }
 0x301   :  { %640 = vsyncadd [#allocation7], 4294967280 }
 0x302   :  { %336 = vsyncpa [#allocation6], 1 }
 0x303   :  { %337 = vsyncpa [#allocation9], 1 }
 0x304   :  { %338 = vsyncpa [#allocation7], 1 }
 0x305   :  { %339 = vsyncmov [#allocation4] }
 0x308   :  { %s340_s13 = vpop.sfrf %339 }
 0x309   :  { %p353_p12 = scmp.ne.s32.totalorder %s340_s13, 0 }
 0x30b   :  { %344 = shalt.err (%p353_p12)  }
 0x30c   :  { %346 = vsyncmov [#allocation4 + $0x1] }
 0x30f   :  { %s347_s14 = vpop.sfrf %346 }
 0x310   :  { %p354_p13 = scmp.ne.s32.totalorder %s347_s14, 0 }
 0x312   :  { %351 = shalt.err (%p354_p13)  }

</bundles_post_ra>
